<compile_context>
chip_gen: v5e
topology: v5e:2x2
jax: 0.10.0
libtpu: 0.0.40
codegen_flags: <defaults>
</compile_context>

<pallas_src>
import jax
import jax.numpy as jnp
from jax import lax
from jax.experimental import pallas as pl
from jax.experimental.pallas import tpu as pltpu


def _round_up(x, m):
    return (x + m - 1) // m * m


def _make_focal_kernel(alpha, gamma, reduction, n, tm):
    alpha = float(alpha)
    gamma = float(gamma)
    needs_mask = (n % tm) != 0  # last block has padded rows

    def kernel(logits_ref, tgt_ref, out_ref):
        logits = logits_ref[...].astype(jnp.float32)           # (tm, C)
        tgt = tgt_ref[...]                                     # (tm, 1) int32

        if needs_mask:
            row = (lax.broadcasted_iota(jnp.int32, (logits.shape[0], 1), 0)
                   + pl.program_id(0) * tm)                    # (tm, 1)
            valid = row < n
            # Clamp padded rows so no inf/nan can leak through the LSE.
            logits = jnp.where(valid, logits, 0.0)

        # numerically-stable log-sum-exp over classes (lane axis)
        m = jnp.max(logits, axis=-1, keepdims=True)            # (tm, 1)
        lse = jnp.log(jnp.sum(jnp.exp(logits - m), axis=-1, keepdims=True)) + m

        # gather target logit via one-hot mask (no dynamic gather on TPU)
        col = lax.broadcasted_iota(jnp.int32, logits.shape, 1)  # (tm, C)
        tgt_logit = jnp.sum(jnp.where(col == tgt, logits, 0.0),
                            axis=-1, keepdims=True)             # (tm, 1)

        ce = lse - tgt_logit                                    # (tm, 1)
        pt = jnp.exp(-ce)
        ompt = 1.0 - pt
        if gamma == 2.0:
            w = ompt * ompt          # VALU multiply instead of EUP pow
        elif gamma == 1.0:
            w = ompt
        elif gamma == 0.0:
            w = jnp.ones_like(ompt)
        else:
            w = ompt ** gamma
        focal = alpha * w * ce                                  # (tm, 1)

        if needs_mask:
            focal = jnp.where(valid, focal, 0.0)

        if reduction in ("mean", "sum"):
            # Per-block partial sum, broadcast across a full 128-lane row so
            # the store is an unmasked, lane-dense vst.
            partial = jnp.sum(focal)
            out_ref[...] = jnp.full(out_ref.shape, partial, dtype=jnp.float32)
        else:
            # TODO(synk): for C << 128 a lane-packed / transposed layout would
            # fill vregs and allow a lane-dense 'none' output; kept (N,1) here.
            out_ref[...] = focal

    return kernel


def _choose_block_rows(n, c, itemsize, reduction):
    """Largest TM whose double-buffered VMEM working set fits all TPU gens."""
    lane_c = _round_up(max(c, 1), 128)                 # VMEM lane padding
    per_row = 2 * (lane_c * itemsize + 128 * 4)        # logits + (tm,1) int32 tgt
    if reduction not in ("mean", "sum"):
        per_row += 2 * 128 * 4                         # (tm,1) f32 output block
    budget = 20 * 1024 * 1024                          # safe for v5e/v6e/v7x
    tm = budget // per_row
    return max(8, min(2048, (tm // 8) * 8))


def focal_loss(logits, targets, alpha=0.25, gamma=2.0, reduction="mean",
               block_rows=None):
    """Pallas TPU implementation of FocalLoss.forward.

    logits:  (N, C) float32 or bfloat16 (read as-is; upcast inside kernel)
    targets: (N,)   integer class indices
    """
    n, c = logits.shape
    if logits.dtype not in (jnp.float32, jnp.bfloat16):
        logits = logits.astype(jnp.float32)
    itemsize = jnp.dtype(logits.dtype).itemsize
    tgt2d = targets.astype(jnp.int32).reshape(n, 1)

    tm = block_rows if block_rows is not None else _choose_block_rows(
        n, c, itemsize, reduction)
    if tm >= n:
        tm = n                       # single full-extent block
    else:
        tm = max(8, (tm // 8) * 8)   # (8,128) sublane alignment when tiled
    nb = pl.cdiv(n, tm)

    in_specs = [
        pl.BlockSpec((tm, c), lambda i: (i, 0)),
        pl.BlockSpec((tm, 1), lambda i: (i, 0)),
    ]

    if reduction in ("mean", "sum"):
        out_shape = jax.ShapeDtypeStruct((nb, 128), jnp.float32)
        out_specs = pl.BlockSpec((1, 128), lambda i: (i, 0))
        out_bytes = nb * 128 * 4
    else:
        out_shape = jax.ShapeDtypeStruct((n, 1), jnp.float32)
        out_specs = pl.BlockSpec((tm, 1), lambda i: (i, 0))
        out_bytes = n * 4

    cost = pl.CostEstimate(
        flops=8 * n * c,
        transcendentals=n * c + 2 * n,
        bytes_accessed=n * c * itemsize + n * 4 + out_bytes,
    )

    out = pl.pallas_call(
        _make_focal_kernel(alpha, gamma, reduction, n, tm),
        out_shape=out_shape,
        grid=(nb,),
        in_specs=in_specs,
        out_specs=out_specs,
        compiler_params=pltpu.CompilerParams(
            dimension_semantics=("parallel",),
            vmem_limit_bytes=32 * 1024 * 1024,
        ),
        cost_estimate=cost,
    )(logits, tgt2d)

    if reduction == "mean":
        return jnp.sum(out[:, 0]) / jnp.float32(n)
    elif reduction == "sum":
        return jnp.sum(out[:, 0])
    return out[:, 0]


def _focal_loss_ref(logits, targets, alpha=0.25, gamma=2.0, reduction="mean"):
    # pure-JAX reference for sanity checking
    logits = logits.astype(jnp.float32)
    logp = jax.nn.log_softmax(logits, axis=-1)
    ce = -jnp.take_along_axis(logp, targets[:, None].astype(jnp.int32),
                              axis=-1)[:, 0]
    pt = jnp.exp(-ce)
    fl = alpha * (1.0 - pt) ** gamma * ce
    if reduction == "mean":
        return fl.mean()
    if reduction == "sum":
        return fl.sum()
    return fl


if __name__ == "__main__":
    key = jax.random.PRNGKey(0)
    k1, k2 = jax.random.split(key)

    # Small shape consistent with a classification head.
    N, C = 8, 16
    logits = jax.random.normal(k1, (N, C), dtype=jnp.float32)
    targets = jax.random.randint(k2, (N,), 0, C, dtype=jnp.int32)

    loss = jax.block_until_ready(focal_loss(logits, targets))
    ref = _focal_loss_ref(logits, targets)
    assert jnp.allclose(loss, ref, rtol=1e-5, atol=1e-5), (loss, ref)

    # Multi-block grid + tail-row masking path (forces TM=64, 5 blocks).
    N2, C2 = 300, 16
    logits2 = jax.random.normal(k1, (N2, C2), dtype=jnp.float32)
    targets2 = jax.random.randint(k2, (N2,), 0, C2, dtype=jnp.int32)
    for red in ("mean", "sum", "none"):
        got = jax.block_until_ready(
            focal_loss(logits2, targets2, reduction=red, block_rows=64))
        want = _focal_loss_ref(logits2, targets2, reduction=red)
        assert jnp.allclose(got, want, rtol=1e-5, atol=1e-5), (red, got, want)

    # bf16 logits consumed directly (no wrapper f32 copy); both paths upcast
    # the same bf16-rounded values so results agree tightly.
    logits_bf16 = logits2.astype(jnp.bfloat16)
    got_bf = jax.block_until_ready(
        focal_loss(logits_bf16, targets2, block_rows=64))
    want_bf = _focal_loss_ref(logits_bf16, targets2)
    assert jnp.allclose(got_bf, want_bf, rtol=1e-4, atol=1e-4), (got_bf, want_bf)

    print("KERNEL_OK")
</pallas_src>

<mosaic_0001>
module attributes {stable_mosaic.version = 11 : i64} {
  func.func @kernel(%arg0: i32, %arg1: memref<8x16xf32, #tpu.memory_space<vmem>>, %arg2: memref<8x1xi32, #tpu.memory_space<vmem>>, %arg3: memref<1x128xf32, #tpu.memory_space<vmem>>) attributes {dimension_semantics = [#tpu.dimension_semantics<parallel>], iteration_bounds = array<i64: 1>, scalar_prefetch = 0 : i64, scratch_operands = 0 : i64, tpu.core_type = #tpu.core_type<tc>, window_params = [{transform_indices = @transform_0, window_bounds = array<i64: 8, 16>}, {transform_indices = @transform_1, window_bounds = array<i64: 8, 1>}, {transform_indices = @transform_2, window_bounds = array<i64: 1, 128>}]} {
    %c0 = arith.constant 0 : index
    %c0_0 = arith.constant 0 : index
    %0 = vector.load %arg1[%c0, %c0_0] : memref<8x16xf32, #tpu.memory_space<vmem>>, vector<8x16xf32>
    %c0_1 = arith.constant 0 : index
    %c0_2 = arith.constant 0 : index
    %1 = vector.load %arg2[%c0_1, %c0_2] : memref<8x1xi32, #tpu.memory_space<vmem>>, vector<8x1xi32>
    %cst = arith.constant dense<0xFF800000> : vector<8xf32>
    %2 = vector.multi_reduction <maximumf>, %0, %cst [1] : vector<8x16xf32> to vector<8xf32>
    %3 = vector.shape_cast %2 : vector<8xf32> to vector<8x1xf32>
    %4 = vector.broadcast %3 : vector<8x1xf32> to vector<8x16xf32>
    %5 = arith.subf %0, %4 : vector<8x16xf32>
    %6 = math.exp %5 : vector<8x16xf32>
    %cst_3 = arith.constant dense<0.000000e+00> : vector<8xf32>
    %7 = vector.multi_reduction <add>, %6, %cst_3 [1] : vector<8x16xf32> to vector<8xf32>
    %8 = vector.shape_cast %7 : vector<8xf32> to vector<8x1xf32>
    %9 = math.log %8 : vector<8x1xf32>
    %10 = arith.addf %9, %3 : vector<8x1xf32>
    %11 = tpu.iota {dimensions = array<i32: 1>} : vector<8x16xi32>
    %12 = vector.broadcast %1 : vector<8x1xi32> to vector<8x16xi32>
    %13 = arith.cmpi eq, %11, %12 : vector<8x16xi32>
    %cst_4 = arith.constant 0.000000e+00 : f32
    %14 = vector.broadcast %cst_4 : f32 to vector<8x16xf32>
    %15 = arith.select %13, %0, %14 : vector<8x16xi1>, vector<8x16xf32>
    %cst_5 = arith.constant dense<0.000000e+00> : vector<8xf32>
    %16 = vector.multi_reduction <add>, %15, %cst_5 [1] : vector<8x16xf32> to vector<8xf32>
    %17 = vector.shape_cast %16 : vector<8xf32> to vector<8x1xf32>
    %18 = arith.subf %10, %17 : vector<8x1xf32>
    %cst_6 = arith.constant 0.000000e+00 : f32
    %19 = vector.broadcast %cst_6 : f32 to vector<8x1xf32>
    %20 = arith.subf %19, %18 : vector<8x1xf32>
    %21 = math.exp %20 : vector<8x1xf32>
    %cst_7 = arith.constant 1.000000e+00 : f32
    %22 = vector.broadcast %cst_7 : f32 to vector<8x1xf32>
    %23 = arith.subf %22, %21 : vector<8x1xf32>
    %24 = arith.mulf %23, %23 : vector<8x1xf32>
    %cst_8 = arith.constant 2.500000e-01 : f32
    %25 = vector.broadcast %cst_8 : f32 to vector<8x1xf32>
    %26 = arith.mulf %25, %24 : vector<8x1xf32>
    %27 = arith.mulf %26, %18 : vector<8x1xf32>
    %28 = vector.shape_cast %27 : vector<8x1xf32> to vector<1x8x1xf32>
    %cst_9 = arith.constant dense<0.000000e+00> : vector<1xf32>
    %29 = vector.multi_reduction <add>, %28, %cst_9 [1, 2] : vector<1x8x1xf32> to vector<1xf32>
    %30 = vector.shape_cast %29 : vector<1xf32> to vector<1x1x1xf32>
    %31 = vector.extract %30[0, 0, 0] : f32 from vector<1x1x1xf32>
    %32 = vector.broadcast %31 : f32 to vector<1x128xf32>
    %c0_10 = arith.constant 0 : index
    %c0_11 = arith.constant 0 : index
    %33 = vector.load %arg3[%c0_10, %c0_11] : memref<1x128xf32, #tpu.memory_space<vmem>>, vector<1x128xf32>
    tpu.vector_store %arg3[%c0_10, %c0_11], %32 {strides = array<i32>} : memref<1x128xf32, #tpu.memory_space<vmem>>, vector<1x128xf32>,
    return
  }
  func.func @transform_0(%arg0: i32) -> (i32, i32) {
    %c0_i32 = arith.constant 0 : i32
    %c0_i32_0 = arith.constant 0 : i32
    return %arg0, %c0_i32 : i32, i32
  }
  func.func @transform_1(%arg0: i32) -> (i32, i32) {
    %c0_i32 = arith.constant 0 : i32
    %c0_i32_0 = arith.constant 0 : i32
    return %arg0, %c0_i32 : i32, i32
  }
  func.func @transform_2(%arg0: i32) -> (i32, i32) {
    %c0_i32 = arith.constant 0 : i32
    %c0_i32_0 = arith.constant 0 : i32
    return %arg0, %c0_i32 : i32, i32
  }
}

</mosaic_0001>

<bundles_post_ra>
// kernel: tpu_custom_call.1
= control target key start
LH: loop header
LB: loop body
LE: loop exit
PB: predicated region body
PF: predicated region fallthrough
CT: control target
= control target key end

     0   :  { %vm14_vm0 = vcmask 130048   ;;  %s140_s0 = inlined_call_operand.vmem [shape: f32[8,16], index: 0, kind: input, shape index: {}]   ;;  %s141_s1 = inlined_call_operand.vmem [shape: s32[8,1], index: 1, kind: input, shape index: {}]   ;;  %s142_s2 = inlined_call_operand.hbm [shape: f32[1,128], index: 2, kind: output, shape index: {}]  }
   0x1   :  { %v12_v0 = vld [vmem:[%s140_s0] sm:$0xff] }
   0x2   :  { %7 = vsyncpa [#allocation3], 0  ;;  %v15_v1 = vsel %vm14_vm0, %v12_v0, -inf  ;;  %v111_v2 = vmov 0   ;;  %v13_v3 = vld [vmem:[%s141_s1] sm:$0xff]  ;;  %v27_v9 = vlaneseq  ;;  %vm45_vm2 = vcmask 7168  }
   0x3   :  { %78 = vset.pattern.permute.xlu0 %v111_v2  ;;  %s112_s0 = smov [#allocation2]   ;;  %s65_s15 = sshll.u32 %s142_s2, 4  ;;  %s66_s15 = int_to_ptr.hbm [resolvable:$true] %s65_s15 }
   0x4   :  { %16 = vmax.xlane.f32.xlu0 %v15_v1  ;;  %v28_v10 = vand.u32 127, %v27_v9  ;;  %s63_s1 = sshll.u32 %s112_s0, 4  ;;  %s64_s1 = int_to_ptr.vmem [resolvable:$true] %s63_s1 }
  0x18   :  { %30 = vperm.xlu0 %78, %v13_v3  }
  0x77   :  { %v17_v4 = vpop.xlane.xlu0 %16 }
  0x78   :  { %v18_v5 = vsub.f32 %v12_v0, %v17_v4 }
  0x7a   :  { %v19_v6 = vmul.f32 1.442695, %v18_v5 }
  0x7c   :  { %79 = vpow2.f32 %v19_v6 }
  0x82   :  { %v80_v7 = vpop.eup %79 }
  0x83   :  { %v21_v8 = vsel %vm14_vm0, %v80_v7, 0.0 }
  0x84   :  { %22 = vadd.xlane.f32.xlu1 %v21_v8 }
  0x8a   :  { %v31_v11 = vpop.permute.xlu0 %30 }
  0x8b   :  { %vm32_vm1 = vcmp.eq.s32.totalorder %v28_v10, %v31_v11 }
  0x8c   :  { %v33_v12 = vsel %vm32_vm1, %v12_v0, 0.0 }
  0x8d   :  { %v34_v13 = vsel %vm14_vm0, %v33_v12, 0.0 }
  0x8e   :  { %35 = vadd.xlane.f32.xlu1 %v34_v13 }
  0xf7   :  { %v23_v14 = vpop.xlane.xlu1 %22 }
  0xf8   :  { %81 = vlog2.f32 %v23_v14 }
  0xfe   :  { %v82_v15 = vpop.eup %81 }
  0xff   :  { %v25_v16 = vmul.f32 0.6931472, %v82_v15 }
 0x101   :  { %v26_v17 = vadd.f32 %v25_v16, %v17_v4  ;;  %v36_v18 = vpop.xlane.xlu1 %35 }
 0x103   :  { %v37_v19 = vsub.f32 %v26_v17, %v36_v18 }
 0x105   :  { %v38_v20 = vsub.f32 0.0, %v37_v19 }
 0x107   :  { %v39_v21 = vmul.f32 1.442695, %v38_v20 }
 0x109   :  { %83 = vpow2.f32 %v39_v21 }
 0x10f   :  { %v84_v22 = vpop.eup %83 }
 0x110   :  { %v41_v23 = vsub.f32 1.0, %v84_v22 }
 0x112   :  { %v42_v24 = vmul.f32 %v41_v23, %v41_v23 }
 0x114   :  { %v43_v25 = vmul.f32 0.25, %v42_v24 }
 0x116   :  { %v44_v26 = vmul.f32 %v43_v25, %v37_v19 }
 0x118   :  { %v46_v27 = vsel %vm45_vm2, %v44_v26, 0.0 }
 0x119   :  { %47 = vadd.xlane.f32.xlu2 %v46_v27 }
 0x18c   :  { %v48_v28 = vpop.xlane.xlu2 %47 }
 0x18d   :  { %v49_v29 = vrot.slane %v48_v28, 4 }
 0x18f   :  { %v50_v30 = vadd.f32 %v49_v29, %v48_v28 }
 0x191   :  { %v51_v31 = vrot.slane %v50_v30, 2 }
 0x193   :  { %v52_v32 = vadd.f32 %v51_v31, %v50_v30 }
 0x195   :  { %v53_v33 = vrot.slane %v52_v32, 1 }
 0x197   :  { %v54_v34 = vadd.f32 %v53_v33, %v52_v32 }
 0x199   :  { %74 = vpush %v54_v34 }
 0x1ca   :  { %s75_s16 = spop %74 }
 0x1cb   :  { %v56_v35 = vstv %s75_s16 }
 0x1cc   :  { %57 = vst [vmem:[#allocation2] sm:$0x1] %v56_v35 }
 0x1cd   :  { %68 = dma.vmem_to_hbm [thread:$0]  %s64_s1, 16, %s66_s15, [#allocation3]  }
 0x1ce   :  { %109 = dma.done.wait [#allocation3], 16  }
 0x1cf   :  { %110 = vsyncadd [#allocation3], 4294967280 }
 0x1d0   :  { %73 = vsyncpa [#allocation3], 1 }

</bundles_post_ra>
